<compile_context>
chip_gen: v7x
topology: tpu7x:2x2x1
jax: 0.10.0
libtpu: 0.0.40
codegen_flags: <defaults>
</compile_context>

<pallas_src>
import jax
import jax.numpy as jnp
from jax.experimental import pallas as pl
from jax.experimental.pallas import tpu as pltpu


def _round_up(n, m):
    return ((n + m - 1) // m) * m


def mlp_mapper_kernel(x_ref, w1_ref, b1_ref, w2_ref, b2_ref, o_ref):
    # x is streamed from HBM in its original dtype and cast on-chip.
    x = x_ref[...].astype(w1_ref.dtype)
    h = jnp.dot(x, w1_ref[...], preferred_element_type=jnp.float32)    # MXU, f32 acc
    h = h + b1_ref[...]                                                # f32 bias add
    h = jnp.tanh(h.astype(w2_ref.dtype))                               # EUP (bf16 on v6e/v7x)
    y = jnp.dot(h, w2_ref[...], preferred_element_type=jnp.float32)    # MXU, f32 acc
    y = y + b2_ref[...]
    o_ref[...] = y.astype(o_ref.dtype)


def mlp_mapper(x, w1, b1, w2, b2, *, tm_rows=16384, compute_dtype=jnp.bfloat16):
    """Fused Linear(in->hid) -> Tanh -> Linear(hid->out).

    x:  [B, in_dim]      (any float dtype; cast to compute_dtype inside the kernel)
    w1: [in_dim, hid]    (transposed vs. torch.nn.Linear.weight)
    b1: [hid]
    w2: [hid, out_dim]
    b2: [out_dim]
    returns [B, out_dim] in x.dtype (matches the PyTorch module's forward).
    """
    B, in_dim = x.shape
    hid = w1.shape[1]
    out_dim = w2.shape[1]
    out_dtype = x.dtype

    # ---- Lane-dense packing: fold PK logical rows into one physical row. ----
    PK = 8
    if PK * PK * (in_dim * hid + hid * out_dim) * 2 > (4 << 20):
        PK = 1   # replicated weights would be large -> fall back to unpacked
    xw, hw, ow = PK * in_dim, PK * hid, PK * out_dim

    w1p = jnp.kron(jnp.eye(PK, dtype=compute_dtype), w1.astype(compute_dtype))
    w2p = jnp.kron(jnp.eye(PK, dtype=compute_dtype), w2.astype(compute_dtype))
    b1p = jnp.tile(b1.astype(jnp.float32), PK).reshape(1, hw)
    b2p = jnp.tile(b2.astype(jnp.float32), PK).reshape(1, ow)

    # Pad only to a multiple of PK*8 (never to a multiple of the row tile);
    # a trailing partial tile is masked by Pallas (grid = cdiv).
    b_pad = _round_up(B, PK * 8)
    x_p = jnp.pad(x, ((0, b_pad - B), (0, 0))) if b_pad != B else x
    R = b_pad // PK                                    # packed rows (multiple of 8)
    x_packed = x_p.reshape(R, xw)                      # free: same row-major memory

    # ---- Row tile (in packed rows) & real VMEM budget. ----
    lane = lambda n: _round_up(n, 128)
    x_bytes = x.dtype.itemsize
    o_bytes = jnp.dtype(out_dtype).itemsize
    c_bytes = jnp.dtype(compute_dtype).itemsize
    bytes_per_row = (2 * lane(xw) * x_bytes             # x tile, double buffered
                     + 2 * lane(ow) * o_bytes           # out tile, double buffered
                     + lane(hw) * (4 + c_bytes)         # h (f32 acc + compute copy)
                     + lane(xw) * c_bytes)              # in-kernel x cast temp
    resident = (lane(hw) * _round_up(xw, 16) * c_bytes  # W1' (VMEM-resident)
                + lane(ow) * _round_up(hw, 16) * c_bytes  # W2'
                + lane(hw) * 4 + lane(ow) * 4)          # biases
    vmem_cap = 48 << 20   # inside v7x's 64 MiB/TC; ample headroom on v5e/v6e
    tm_vmem_max = max(8, ((vmem_cap - (4 << 20) - 2 * resident)
                          // (bytes_per_row * 5 // 4)) // 8 * 8)

    tm = _round_up(max(1, -(-tm_rows // PK)), 8)        # requested tile (packed rows)
    tm = min(tm, tm_vmem_max, _round_up(R, 8))
    if R >= 16:                                         # >= 2 grid steps -> megacore
        tm = min(tm, _round_up(-(-R // 2), 8))
    tm = max(8, tm)
    grid = (pl.cdiv(R, tm),)

    tile_bytes = tm * bytes_per_row + resident
    vmem_limit = int(min(max(tile_bytes * 5 // 4 + (2 << 20), 8 << 20), vmem_cap))

    # Advisory cost hint (actual packed-matmul flops / HBM bytes).
    flops = 2 * R * (xw * hw + hw * ow)
    bytes_accessed = (x_packed.size * x_bytes + R * ow * o_bytes
                      + w1p.size * c_bytes + w2p.size * c_bytes
                      + b1p.size * 4 + b2p.size * 4)
    cost = pl.CostEstimate(flops=flops, transcendentals=b_pad * hid,
                           bytes_accessed=bytes_accessed)

    out_packed = pl.pallas_call(
        mlp_mapper_kernel,
        out_shape=jax.ShapeDtypeStruct((R, ow), out_dtype),
        grid_spec=pltpu.PrefetchScalarGridSpec(
            num_scalar_prefetch=0,
            grid=grid,
            in_specs=[
                pl.BlockSpec((tm, xw), lambda i: (i, 0)),    # packed x row tile
                pl.BlockSpec((xw, hw), lambda i: (0, 0)),    # W1' (VMEM-resident)
                pl.BlockSpec((1, hw), lambda i: (0, 0)),     # b1'
                pl.BlockSpec((hw, ow), lambda i: (0, 0)),    # W2' (VMEM-resident)
                pl.BlockSpec((1, ow), lambda i: (0, 0)),     # b2'
            ],
            out_specs=pl.BlockSpec((tm, ow), lambda i: (i, 0)),
        ),
        compiler_params=pltpu.CompilerParams(
            dimension_semantics=("parallel",),   # shard batch across TCs on v7x
            vmem_limit_bytes=vmem_limit,
        ),
        cost_estimate=cost,
    )(x_packed, w1p, b1p, w2p, b2p)

    out = out_packed.reshape(b_pad, out_dim)             # free un-packing reshape
    return out[:B] if b_pad != B else out


if __name__ == "__main__":
    # MLPMapper(input_dim=32, hidden_dim=64, output_dim=16); batch chosen so the
    # ragged-batch path (200 -> 256 rows) and a 2-step parallel grid are exercised.
    B, input_dim, hidden_dim, output_dim = 200, 32, 64, 16

    key = jax.random.PRNGKey(0)
    kx, kw1, kb1, kw2, kb2 = jax.random.split(key, 5)

    x = jax.random.normal(kx, (B, input_dim), dtype=jnp.float32)
    # "PyTorch-like" init (uniform +/- 1/sqrt(fan_in)); weights stored transposed
    # vs nn.Linear.weight, so the kernel computes x @ W1 + b1 -> tanh -> @ W2 + b2.
    lim1 = 1.0 / (input_dim ** 0.5)
    lim2 = 1.0 / (hidden_dim ** 0.5)
    w1 = jax.random.uniform(kw1, (input_dim, hidden_dim), jnp.float32, -lim1, lim1)
    b1 = jax.random.uniform(kb1, (hidden_dim,), jnp.float32, -lim1, lim1)
    w2 = jax.random.uniform(kw2, (hidden_dim, output_dim), jnp.float32, -lim2, lim2)
    b2 = jax.random.uniform(kb2, (output_dim,), jnp.float32, -lim2, lim2)

    out = mlp_mapper(x, w1, b1, w2, b2)
    out = jax.block_until_ready(out)
    assert out.shape == (B, output_dim), out.shape

    # Reference 1: exact f32 forward (loose tol: kernel matmul/tanh inputs are bf16).
    ref_f32 = jnp.tanh(x @ w1 + b1) @ w2 + b2
    err_f32 = float(jnp.max(jnp.abs(out - ref_f32)))
    assert jnp.allclose(out, ref_f32, atol=4e-2, rtol=4e-2), err_f32

    # Reference 2: matched bf16-input / f32-accumulate / bf16-tanh reference.
    xb, w1b, w2b = (t.astype(jnp.bfloat16) for t in (x, w1, w2))
    h_ref = jnp.dot(xb, w1b, preferred_element_type=jnp.float32) + b1
    h_ref = jnp.tanh(h_ref.astype(jnp.bfloat16))
    ref_bf16 = jnp.dot(h_ref, w2b, preferred_element_type=jnp.float32) + b2
    err_bf16 = float(jnp.max(jnp.abs(out - ref_bf16)))
    assert jnp.allclose(out, ref_bf16, atol=2.5e-2, rtol=2.5e-2), err_bf16

    print("KERNEL_OK")
</pallas_src>

<mosaic_0001>
module attributes {stable_mosaic.version = 11 : i64} {
  func.func @mlp_mapper_kernel(%arg0: i32, %arg1: memref<16x256xf32, #tpu.memory_space<vmem>>, %arg2: memref<256x512xbf16, #tpu.memory_space<vmem>>, %arg3: memref<1x512xf32, #tpu.memory_space<vmem>>, %arg4: memref<512x128xbf16, #tpu.memory_space<vmem>>, %arg5: memref<1x128xf32, #tpu.memory_space<vmem>>, %arg6: memref<16x128xf32, #tpu.memory_space<vmem>>) attributes {dimension_semantics = [#tpu.dimension_semantics<parallel>], iteration_bounds = array<i64: 2>, scalar_prefetch = 0 : i64, scratch_operands = 0 : i64, tpu.core_type = #tpu.core_type<tc>, window_params = [{transform_indices = @transform_0, window_bounds = array<i64: 16, 256>}, {pipeline_mode = #tpu.pipeline_mode<synchronous>, transform_indices = @transform_1, window_bounds = array<i64: 256, 512>}, {pipeline_mode = #tpu.pipeline_mode<synchronous>, transform_indices = @transform_2, window_bounds = array<i64: 1, 512>}, {pipeline_mode = #tpu.pipeline_mode<synchronous>, transform_indices = @transform_3, window_bounds = array<i64: 512, 128>}, {pipeline_mode = #tpu.pipeline_mode<synchronous>, transform_indices = @transform_4, window_bounds = array<i64: 1, 128>}, {transform_indices = @transform_5, window_bounds = array<i64: 16, 128>}]} {
    %c0 = arith.constant 0 : index
    %c0_0 = arith.constant 0 : index
    %0 = vector.load %arg1[%c0, %c0_0] : memref<16x256xf32, #tpu.memory_space<vmem>>, vector<16x256xf32>
    %1 = arith.truncf %0 : vector<16x256xf32> to vector<16x256xbf16>
    %c0_1 = arith.constant 0 : index
    %c0_2 = arith.constant 0 : index
    %2 = vector.load %arg2[%c0_1, %c0_2] : memref<256x512xbf16, #tpu.memory_space<vmem>>, vector<256x512xbf16>
    %cst = arith.constant dense<0.000000e+00> : vector<16x512xf32>
    %3 = tpu.matmul %1, %2, %cst {dimension_numbers = #tpu.dot_dimension_numbers<[1], [0], [0], [1], [0, 0, 1, 1], [], []>} : vector<16x256xbf16>, vector<256x512xbf16>, vector<16x512xf32> -> vector<16x512xf32>
    %c0_3 = arith.constant 0 : index
    %c0_4 = arith.constant 0 : index
    %4 = vector.load %arg3[%c0_3, %c0_4] : memref<1x512xf32, #tpu.memory_space<vmem>>, vector<1x512xf32>
    %5 = vector.broadcast %4 : vector<1x512xf32> to vector<16x512xf32>
    %6 = arith.addf %3, %5 : vector<16x512xf32>
    %7 = arith.truncf %6 : vector<16x512xf32> to vector<16x512xbf16>
    %8 = math.tanh %7 : vector<16x512xbf16>
    %c0_5 = arith.constant 0 : index
    %c0_6 = arith.constant 0 : index
    %9 = vector.load %arg4[%c0_5, %c0_6] : memref<512x128xbf16, #tpu.memory_space<vmem>>, vector<512x128xbf16>
    %cst_7 = arith.constant dense<0.000000e+00> : vector<16x128xf32>
    %10 = tpu.matmul %8, %9, %cst_7 {dimension_numbers = #tpu.dot_dimension_numbers<[1], [0], [0], [1], [0, 0, 1, 1], [], []>} : vector<16x512xbf16>, vector<512x128xbf16>, vector<16x128xf32> -> vector<16x128xf32>
    %c0_8 = arith.constant 0 : index
    %c0_9 = arith.constant 0 : index
    %11 = vector.load %arg5[%c0_8, %c0_9] : memref<1x128xf32, #tpu.memory_space<vmem>>, vector<1x128xf32>
    %12 = vector.broadcast %11 : vector<1x128xf32> to vector<16x128xf32>
    %13 = arith.addf %10, %12 : vector<16x128xf32>
    %c0_10 = arith.constant 0 : index
    %c0_11 = arith.constant 0 : index
    %14 = vector.load %arg6[%c0_10, %c0_11] : memref<16x128xf32, #tpu.memory_space<vmem>>, vector<16x128xf32>
    tpu.vector_store %arg6[%c0_10, %c0_11], %13 {strides = array<i32>} : memref<16x128xf32, #tpu.memory_space<vmem>>, vector<16x128xf32>,
    return
  }
  func.func @transform_0(%arg0: i32) -> (i32, i32) {
    %c0_i32 = arith.constant 0 : i32
    %c0_i32_0 = arith.constant 0 : i32
    return %arg0, %c0_i32 : i32, i32
  }
  func.func @transform_1(%arg0: i32) -> (i32, i32) {
    %c0_i32 = arith.constant 0 : i32
    %c0_i32_0 = arith.constant 0 : i32
    %c0_i32_1 = arith.constant 0 : i32
    return %c0_i32, %c0_i32_0 : i32, i32
  }
  func.func @transform_2(%arg0: i32) -> (i32, i32) {
    %c0_i32 = arith.constant 0 : i32
    %c0_i32_0 = arith.constant 0 : i32
    %c0_i32_1 = arith.constant 0 : i32
    return %c0_i32, %c0_i32_0 : i32, i32
  }
  func.func @transform_3(%arg0: i32) -> (i32, i32) {
    %c0_i32 = arith.constant 0 : i32
    %c0_i32_0 = arith.constant 0 : i32
    %c0_i32_1 = arith.constant 0 : i32
    return %c0_i32, %c0_i32_0 : i32, i32
  }
  func.func @transform_4(%arg0: i32) -> (i32, i32) {
    %c0_i32 = arith.constant 0 : i32
    %c0_i32_0 = arith.constant 0 : i32
    %c0_i32_1 = arith.constant 0 : i32
    return %c0_i32, %c0_i32_0 : i32, i32
  }
  func.func @transform_5(%arg0: i32) -> (i32, i32) {
    %c0_i32 = arith.constant 0 : i32
    %c0_i32_0 = arith.constant 0 : i32
    return %arg0, %c0_i32 : i32, i32
  }
}

</mosaic_0001>

<bundles_post_ra>
// kernel: tpu_custom_call.1
= control target key start
LH: loop header
LB: loop body
LE: loop exit
PB: predicated region body
PF: predicated region fallthrough
CT: control target
= control target key end

     0   :  { %10 = vsyncpa [#allocation3], 0  ;;  %s2058_s0 = inlined_call_operand.hbm [shape: f32[32,256], index: 0, kind: input, shape index: {}]   ;;  %s2059_s1 = inlined_call_operand.hbm [shape: bf16[256,512], index: 1, kind: input, shape index: {}]   ;;  %s2060_s2 = inlined_call_operand.vmem [shape: f32[1,512], index: 2, kind: input, shape index: {}]   ;;  %s2061_s3 = inlined_call_operand.hbm [shape: bf16[512,128], index: 3, kind: input, shape index: {}]   ;;  %s2062_s4 = inlined_call_operand.vmem [shape: f32[1,128], index: 4, kind: input, shape index: {}]   ;;  %s2063_s5 = inlined_call_operand.hbm [shape: f32[32,128], index: 5, kind: output, shape index: {}]  }
   0x1   :  { %12 = vsyncpa [#allocation3 + $0x1], 0 }
   0x2   :  { %13 = vsyncpa [#allocation6], 0 }
   0x3   :  { %14 = vsyncpa [#allocation4], 0 }
   0x4   :  { %16 = vsyncpa [#allocation4 + $0x1], 0  ;;  %s1805_s18 = smov 0   ;;  %s1807_s19 = smov 0  }
   0x5   :  { %s1809_s20 = smov 0   ;;  %s1811_s21 = smov 0  }
   0x6 LB: > { %s1826_s22 = sadd.s32 4294967295, %s1763_s21   ;;  %s1235_s23 = sadd.s32 4294967294, %s1763_s21   ;;  %s1763_s21 = sphi %s1811_s21, %s2083_s21   ;;  %s1759_s20 = sphi %s1809_s20, %s2082_s20   ;;  %s1755_s19 = sphi %s1807_s19, %s2081_s19   ;;  %s1751_s18 = sphi %s1805_s18, %s2080_s18  }
   0x7   : > { %p42_p0 = scmp.ne.s32.totalorder %s1755_s19, %s1751_s18  ;;  %p2064_p1 = scmp.eq.s32.totalorder %s1826_s22, 0 }
   0x8   : > { %p156_p3 = scmp.eq.s32.totalorder %s1235_s23, 1  ;;  %p1236_p5 = scmp.ge.s32.totalorder %s1763_s21, 1 }
   0x9   : > { %p1835_p4 = por %p2064_p1, %p42_p0  ;;  %p163_p7 = scmp.lt.s32.totalorder %s1763_s21, 3 }
   0xa   : > { %p1840_p6 = por %p156_p3, %p42_p0  ;;  %s1765_s27 = smov [#allocation5]  }
   0xb   : > { %s2067_s24 = scalar_select %p1835_p4, 1, 0 }
   0xc   : > { %s2068_s25 = scalar_select %p1840_p6, 1, 0 }
   0xd   : > { %p1845_p8 = pnand %p1236_p5, %p163_p7  ;;  %s175_s28 = sshll.u32 %s1765_s27, 4  ;;  %s1849_s28 = int_to_ptr.vmem [resolvable:$true] %s175_s28 }
   0xe   : > { %s1766_s30 = smov [#allocation7]   ;;  %s1607_s9 = scalar_lea.hbm %s2059_s1, 8192 }
   0xf   : > { %p1410_p9 = pneg %p1845_p8  ;;  %s191_s6 = sshll.u32 %s1766_s30, 4  ;;  %s1860_s6 = int_to_ptr.vmem [resolvable:$true] %s191_s6 }
  0x10   : > { %p1608_p12 = scmp.ne.s32.totalorder %s2059_s1, %s1607_s9  ;;  %p1614_p5 = scmp.lt.u32.totalorder %s1607_s9, %s2059_s1 }
  0x11   : > { %p1856_p11 = pnand %p1410_p9, %p2064_p1 }
  0x13   : > { %p1609_p13 = pneg %p1856_p11 }
  0x15   : > { %p1610_p0 = pnand %p1609_p13, %p1608_p12 }
  0x17   : > { %p1611_p3 = pneg %p1610_p0 }
  0x19   : > { %p1616_p7 = pnand %p1614_p5, %p1611_p3 }
  0x1b   : > { %1619 = shalt.err (!%p1616_p7)
}
  0x1c   : > { %s1620_s14 = scalar_lea.vmem %s1849_s28, 8192  ;;  %p1628_p2 = scmp.lt.s32.totalorder %s1849_s28, %s1849_s28 }
  0x1d   : > { %p1621_p9 = scmp.ne.s32.totalorder %s1849_s28, %s1620_s14  ;;  %p1629_p12 = scmp.lt.s32.totalorder %s1620_s14, %s1620_s14 }
  0x1f   : > { %p1623_p10 = pnand %p1621_p9, %p1609_p13  ;;  %p1630_p0 = por %p1629_p12, %p1628_p2 }
  0x21   : > { %p1624_p1 = pneg %p1623_p10 }
  0x23   : > { %p1631_p6 = pnand %p1630_p0, %p1624_p1 }
  0x25   : > { %1634 = shalt.err (!%p1631_p6)
}
  0x26   : > { %s1767_s15 = smov 256   ;;  %s1768_s16 = smov 16  }
  0x27   : > { %1413 = dma.hbm_to_vmem [thread:$0]  (!%p1856_p11), %s2059_s1, 8192, %s1849_s28, [#allocation6], %s1767_s15, %s1767_s15, %s1768_s16  }
  0x28   : > { %s1635_s7 = scalar_lea.hbm %s2061_s3, 4096 }
  0x29   : > { %p1636_p1 = scmp.ne.s32.totalorder %s2061_s3, %s1635_s7  ;;  %p1642_p10 = scmp.lt.u32.totalorder %s1635_s7, %s2061_s3 }
  0x2b   : > { %p1638_p2 = pnand %p1636_p1, %p1609_p13 }
  0x2d   : > { %p1639_p6 = pneg %p1638_p2 }
  0x2f   : > { %p1644_p3 = pnand %p1642_p10, %p1639_p6 }
  0x31   : > { %1647 = shalt.err (!%p1644_p3)
}
  0x32   : > { %s1648_s28 = scalar_lea.vmem %s1860_s6, 4096  ;;  %p1656_p12 = scmp.lt.s32.totalorder %s1860_s6, %s1860_s6 }
  0x33   : > { %p1649_p5 = scmp.ne.s32.totalorder %s1860_s6, %s1648_s28  ;;  %p1657_p0 = scmp.lt.s32.totalorder %s1648_s28, %s1648_s28 }
  0x35   : > { %p1651_p7 = pnand %p1649_p5, %p1609_p13  ;;  %p1658_p1 = por %p1657_p0, %p1656_p12 }
  0x37   : > { %p1652_p9 = pneg %p1651_p7 }
  0x39   : > { %p1659_p2 = pnand %p1658_p1, %p1652_p9 }
  0x3b   : > { %1662 = shalt.err (!%p1659_p2)
}
  0x3c   : > { %s1769_s12 = smov 64   ;;  %s1770_s13 = smov 4  }
  0x3d   : > { %1416 = dma.hbm_to_vmem [thread:$0]  (!%p1856_p11), %s2061_s3, 4096, %s1860_s6, [#allocation6], %s1769_s12, %s1769_s12, %s1770_s13  }
  0x3e   : > { %s1918_s23 = sadd.s32 1, %s1763_s21   ;;  %s29_s30 = sadd.s32 1, %s1759_s20 }
  0x3f   : > { %s26_s27 = ssub.s32 %s1763_s21, %s1918_s23  ;;  %p36_p6 = scmp.ne.s32.totalorder %s1759_s20, %s1755_s19 }
  0x40   : > { %p27_p13 = scmp.eq.s32.totalorder %s26_s27, 0  ;;  %p37_p10 = scmp.eq.s32.totalorder %s1763_s21, 0 }
  0x41   : > { %p2071_p5 = scmp.eq.s32.totalorder %s1826_s22, 1  ;;  %p1427_p9 = scmp.lt.s32.totalorder %s1763_s21, 2 }
  0x42   : > { %s1927_s7 = scalar_select %p27_p13, %s1759_s20, %s29_s30  }
  0x43   : > { %p38_p3 = por %p37_p10, %p36_p6  ;;  %p1931_p7 = por %p2071_p5, %p36_p6 }
  0x44   : > { %s208_s29 = sand.u32 1, %s1759_s20   ;;  %s1352_s6 = sshll.u32 %s1763_s21, 9 }
  0x45   : > { %s2072_s8 = scalar_select %p1931_p7, 1, 0 }
  0x46   : > { %s1240_s9 = sshll.u32 %s208_s29, 5  ;;  %s1941_s28 = scalar_lea.hbm %s2058_s0, %s1352_s6 }
  0x47   : > { %s212_s12 = scalar_lea.vmem [#allocation2], %s1240_s9  ;;  %p1945_p11 = pnand %p1427_p9, %p38_p3 }
  0x48   : > { %s220_s13 = sshll.u32 %s212_s12, 4  ;;  %s1949_s17 = scalar_lea.sflag [#allocation3], %s208_s29  ;;  %s1943_s13 = int_to_ptr.vmem [resolvable:$true] %s220_s13 }
  0x49   : > { %s1663_s27 = scalar_lea.hbm %s1941_s28, 512  ;;  %p1665_p0 = pneg %p1945_p11 }
  0x4a   : > { %p1664_p12 = scmp.ne.s32.totalorder %s1941_s28, %s1663_s27  ;;  %s1668_s6 = scalar_lea.hbm %s2058_s0, 1024 }
  0x4b   : > { %p1669_p13 = scmp.lt.u32.totalorder %s1941_s28, %s2058_s0  ;;  %p1670_p6 = scmp.lt.u32.totalorder %s1668_s6, %s1663_s27 }
  0x4c   : > { %p1666_p1 = pnand %p1665_p0, %p1664_p12  ;;  %p1672_p3 = scmp.lt.u32.totalorder %s1663_s27, %s1941_s28 }
  0x4d   : > { %p1671_p10 = por %p1670_p6, %p1669_p13 }
  0x4e   : > { %p1667_p2 = pneg %p1666_p1 }
  0x4f   : > { %p1673_p5 = por %p1672_p3, %p1671_p10 }
  0x51   : > { %p1674_p9 = pnand %p1673_p5, %p1667_p2 }
  0x53   : > { %1677 = shalt.err (!%p1674_p9)
}
  0x54   : > { %s1678_s29 = scalar_lea.vmem %s1943_s13, 512  ;;  %s1771_s12 = smov [#allocation2]  }
  0x55   : > { %p1679_p12 = scmp.ne.s32.totalorder %s1943_s13, %s1678_s29  ;;  %s1683_s30 = sshll.u32 %s1771_s12, 4  ;;  %s1684_s30 = int_to_ptr.vmem [resolvable:$false] %s1683_s30 }
  0x56   : > { %s1685_s9 = scalar_lea.vmem %s1684_s30, 1024  ;;  %p1686_p4 = scmp.lt.s32.totalorder %s1943_s13, %s1684_s30 }
  0x57   : > { %p1681_p1 = pnand %p1679_p12, %p1665_p0  ;;  %p1687_p13 = scmp.lt.s32.totalorder %s1685_s9, %s1678_s29 }
  0x59   : > { %p1682_p7 = pneg %p1681_p1  ;;  %p1688_p6 = por %p1687_p13, %p1686_p4 }
  0x5b   : > { %p1689_p10 = pnand %p1688_p6, %p1682_p7 }
  0x5d   : > { %1692 = shalt.err (!%p1689_p10)
}
  0x5e   : > { %1420 = dma.hbm_to_vmem [thread:$0]  (!%p1945_p11), %s1941_s28, 512, %s1943_s13, %s1949_s17, %s1767_s15, %s1767_s15, %s1768_s16  }
  0x5f   : > { %232 = sbr.rel (%p1845_p8) target bundleno = 639 (0x27f), region = 40  ;;  %s1983_s27 = sand.u32 (!%p1845_p8), 1, %s1755_s19  }
  0x60   : > { %s1245_s6 = sshll.u32 (!%p1845_p8), %s1983_s27, 5  ;;  %s235_s10 = scalar_lea.sflag (!%p1845_p8), [#allocation3], %s1983_s27 }
  0x61   : > { %s1987_s11 = scalar_lea.vmem (!%p1845_p8), [#allocation2], %s1245_s6  ;;  %p2074_p4 = scmp.ne.s32.totalorder (!%p1845_p8), %s2067_s24, 0 }
  0x66   : > { %1738 = dma.done.wait (%p2074_p4), %s235_s10, 512  }
  0x67   : > { %1740 = vsyncadd (%p2074_p4), %s235_s10, 4294966784  ;;  %p2075_p7 = scmp.eq.s32.totalorder %s1826_s22, 0 }
  0x69   : > { %1742 = dma.done.wait (%p2075_p7), [#allocation6], 12288   ;;  %p2076_p8 = pmov %p2075_p7 }
  0x6a   : > { %v1471_v0 = vld [vmem:[#allocation5 + $0x4] ss:$16 sps:$4 sm:$0xff]   ;;  %v1473_v1 = vld [vmem:[#allocation5 + $0xc] ss:$16 sps:$4 sm:$0xff]   ;;  %v1475_v2 = vld [vmem:[#allocation5] ss:$16 sps:$4 sm:$0xff]  }
  0x6b   : > { %1744 = vsyncadd (%p2076_p8), [#allocation6], 4294955008  ;;  %688 = vmatprep.subr.bf16.mxu0 %v1471_v0  ;;  %v1476_v3 = vld [vmem:[#allocation5 + $0x8] ss:$16 sps:$4 sm:$0xff]   ;;  %731 = vmatprep.subr.bf16.mxu1 %v1473_v1  ;;  %v1477_v4 = vld [vmem:[#allocation5 + $0x24] ss:$16 sps:$4 sm:$0xff]  }
  0x6c   : > { %689 = vmatpush1.bf16.msra.mxu0 %v1475_v2  ;;  %732 = vmatpush1.bf16.msra.mxu1 %v1476_v3  ;;  %v1479_v5 = vld [vmem:[#allocation5 + $0x2c] ss:$16 sps:$4 sm:$0xff]   ;;  %v1481_v6 = vld [vmem:[#allocation5 + $0x20] ss:$16 sps:$4 sm:$0xff]   ;;  %v1482_v7 = vld [vmem:[#allocation5 + $0x28] ss:$16 sps:$4 sm:$0xff]  }
  0x6d   : > { %690 = vmatprep.subr.bf16.mxu0 %v1477_v4  ;;  %733 = vmatprep.subr.bf16.mxu1 %v1479_v5  ;;  %v1483_v8 = vld [vmem:[#allocation5 + $0x44] ss:$16 sps:$4 sm:$0xff]   ;;  %v1485_v9 = vld [vmem:[#allocation5 + $0x4c] ss:$16 sps:$4 sm:$0xff]   ;;  %v1487_v10 = vld [vmem:[#allocation5 + $0x40] ss:$16 sps:$4 sm:$0xff]  }
  0x6e   : > { %v1488_v11 = vld [vmem:[#allocation5 + $0x48] ss:$16 sps:$4 sm:$0xff]   ;;  %v1489_v12 = vld [vmem:[#allocation5 + $0x64] ss:$16 sps:$4 sm:$0xff]   ;;  %v1491_v13 = vld [vmem:[#allocation5 + $0x6c] ss:$16 sps:$4 sm:$0xff]  }
  0x6f   : > { %v1493_v14 = vld [vmem:[#allocation5 + $0x60] ss:$16 sps:$4 sm:$0xff]   ;;  %v1494_v15 = vld [vmem:[#allocation5 + $0x68] ss:$16 sps:$4 sm:$0xff]   ;;  %v1495_v16 = vld [vmem:[#allocation5 + $0x84] ss:$16 sps:$4 sm:$0xff]  }
  0x70   : > { %691 = vmatpush1.bf16.msra.mxu0 %v1481_v6  ;;  %734 = vmatpush1.bf16.msra.mxu1 %v1482_v7  ;;  %v1497_v17 = vld [vmem:[#allocation5 + $0x8c] ss:$16 sps:$4 sm:$0xff]   ;;  %v1499_v18 = vld [vmem:[#allocation5 + $0x80] ss:$16 sps:$4 sm:$0xff]   ;;  %v1500_v19 = vld [vmem:[#allocation5 + $0x88] ss:$16 sps:$4 sm:$0xff]  }
  0x71   : > { %692 = vmatprep.subr.bf16.mxu0 %v1483_v8  ;;  %735 = vmatprep.subr.bf16.mxu1 %v1485_v9  ;;  %v1501_v20 = vld [vmem:[#allocation5 + $0xa4] ss:$16 sps:$4 sm:$0xff]   ;;  %v1503_v21 = vld [vmem:[#allocation5 + $0xac] ss:$16 sps:$4 sm:$0xff]   ;;  %v1505_v22 = vld [vmem:[#allocation5 + $0xa0] ss:$16 sps:$4 sm:$0xff]  }
  0x72   : > { %v1506_v23 = vld [vmem:[#allocation5 + $0xa8] ss:$16 sps:$4 sm:$0xff]   ;;  %v1507_v24 = vld [vmem:[#allocation5 + $0xc4] ss:$16 sps:$4 sm:$0xff]   ;;  %v1509_v25 = vld [vmem:[#allocation5 + $0xcc] ss:$16 sps:$4 sm:$0xff]  }
  0x73   : > { %v1511_v26 = vld [vmem:[#allocation5 + $0xc0] ss:$16 sps:$4 sm:$0xff]   ;;  %v1512_v27 = vld [vmem:[#allocation5 + $0xc8] ss:$16 sps:$4 sm:$0xff]   ;;  %v1513_v28 = vld [vmem:[#allocation5 + $0xe4] ss:$16 sps:$4 sm:$0xff]  }
  0x74   : > { %693 = vmatpush1.bf16.msra.mxu0 %v1487_v10  ;;  %736 = vmatpush1.bf16.msra.mxu1 %v1488_v11  ;;  %v1515_v29 = vld [vmem:[#allocation5 + $0xec] ss:$16 sps:$4 sm:$0xff]   ;;  %v1517_v30 = vld [vmem:[#allocation5 + $0xe0] ss:$16 sps:$4 sm:$0xff]   ;;  %v1518_v31 = vld [vmem:[#allocation5 + $0xe8] ss:$16 sps:$4 sm:$0xff]  }
  0x75   : > { %694 = vmatprep.subr.bf16.mxu0 %v1489_v12  ;;  %737 = vmatprep.subr.bf16.mxu1 %v1491_v13  ;;  %v1519_v32 = vld [vmem:[#allocation5 + $0x104] ss:$16 sps:$4 sm:$0xff]   ;;  %v1521_v33 = vld [vmem:[#allocation5 + $0x10c] ss:$16 sps:$4 sm:$0xff]   ;;  %v1523_v34 = vld [vmem:[#allocation5 + $0x100] ss:$16 sps:$4 sm:$0xff]  }
  0x76   : > { %v1524_v35 = vld [vmem:[#allocation5 + $0x108] ss:$16 sps:$4 sm:$0xff]   ;;  %v1525_v36 = vld [vmem:[#allocation5 + $0x124] ss:$16 sps:$4 sm:$0xff]   ;;  %v1527_v37 = vld [vmem:[#allocation5 + $0x12c] ss:$16 sps:$4 sm:$0xff]  }
  0x77   : > { %v1529_v38 = vld [vmem:[#allocation5 + $0x120] ss:$16 sps:$4 sm:$0xff]   ;;  %v1530_v39 = vld [vmem:[#allocation5 + $0x128] ss:$16 sps:$4 sm:$0xff]   ;;  %v1531_v40 = vld [vmem:[#allocation5 + $0x144] ss:$16 sps:$4 sm:$0xff]  }
  0x78   : > { %695 = vmatpush1.bf16.msra.mxu0 %v1493_v14  ;;  %738 = vmatpush1.bf16.msra.mxu1 %v1494_v15  ;;  %v1533_v41 = vld [vmem:[#allocation5 + $0x14c] ss:$16 sps:$4 sm:$0xff]   ;;  %v1535_v42 = vld [vmem:[#allocation5 + $0x140] ss:$16 sps:$4 sm:$0xff]   ;;  %v1536_v43 = vld [vmem:[#allocation5 + $0x148] ss:$16 sps:$4 sm:$0xff]  }
  0x79   : > { %696 = vmatprep.subr.bf16.mxu0 %v1495_v16  ;;  %739 = vmatprep.subr.bf16.mxu1 %v1497_v17  ;;  %v1537_v44 = vld [vmem:[#allocation5 + $0x164] ss:$16 sps:$4 sm:$0xff]   ;;  %v1539_v45 = vld [vmem:[#allocation5 + $0x16c] ss:$16 sps:$4 sm:$0xff]   ;;  %v1541_v47 = vld [vmem:[#allocation5 + $0x160] ss:$16 sps:$4 sm:$0xff]  }
  0x7a   : > { %v277_v46 = vld [vmem:[%s1987_s11 + $0x8] sm:$0xff]  ;;  %v279_v49 = vld [vmem:[%s1987_s11 + $0x18] sm:$0xff]  ;;  %v1543_v50 = vld [vmem:[#allocation5 + $0x184] ss:$16 sps:$4 sm:$0xff]   ;;  %s1248_s15 = sshll.u32 %s1983_s27, 4  ;;  %s1353_s17 = sshll.u32 %s1826_s22, 8 }
  0x7b   : > { %v1542_v48 = vld [vmem:[#allocation5 + $0x168] ss:$16 sps:$4 sm:$0xff]   ;;  %v281_v51 = vpack.c.bf16 %v279_v49, %v277_v46  ;;  %v1545_v52 = vld [vmem:[#allocation5 + $0x18c] ss:$16 sps:$4 sm:$0xff]   ;;  %v1547_v53 = vld [vmem:[#allocation5 + $0x180] ss:$16 sps:$4 sm:$0xff]   ;;  %s2014_s30 = scalar_lea.hbm %s2063_s5, %s1353_s17 }
  0x7c   : > { %697 = vmatpush1.bf16.msra.mxu0 %v1499_v18  ;;  %740 = vmatpush1.bf16.msra.mxu1 %v1500_v19  ;;  %v1548_v54 = vld [vmem:[#allocation5 + $0x188] ss:$16 sps:$4 sm:$0xff]   ;;  %v1549_v55 = vld [vmem:[#allocation5 + $0x1a4] ss:$16 sps:$4 sm:$0xff]   ;;  %v1551_v56 = vld [vmem:[#allocation5 + $0x1ac] ss:$16 sps:$4 sm:$0xff]  }
  0x7d   : > { %698 = vmatprep.subr.bf16.mxu0 %v1501_v20  ;;  %741 = vmatprep.subr.bf16.mxu1 %v1503_v21  ;;  %v1553_v57 = vld [vmem:[#allocation5 + $0x1a0] ss:$16 sps:$4 sm:$0xff]   ;;  %v1554_v58 = vld [vmem:[#allocation5 + $0x1a8] ss:$16 sps:$4 sm:$0xff]   ;;  %v1555_v59 = vld [vmem:[#allocation5 + $0x1c4] ss:$16 sps:$4 sm:$0xff]  }
  0x7e   : > { %720 = vmatprep.mubr.bf16.mxu0 %v281_v51  ;;  %763 = vmatprep.mubr.bf16.mxu1 %v281_v51  ;;  %v1557_v60 = vld [vmem:[#allocation5 + $0x1cc] ss:$16 sps:$4 sm:$0xff]   ;;  %v1559_v61 = vld [vmem:[#allocation5 + $0x1c0] ss:$16 sps:$4 sm:$0xff]   ;;  %v1560_v62 = vld [vmem:[#allocation5 + $0x1c8] ss:$16 sps:$4 sm:$0xff]  }
  0x7f   : > { %v1561_v63 = vld [vmem:[#allocation5 + $0x1e4] ss:$16 sps:$4 sm:$0xff]   ;;  %v1563_v0 = vld [vmem:[#allocation5 + $0x1ec] ss:$16 sps:$4 sm:$0xff]   ;;  %v1565_v1 = vld [vmem:[#allocation5 + $0x1e0] ss:$16 sps:$4 sm:$0xff]  }
  0x80   : > { %699 = vmatpush1.bf16.msra.mxu0 %v1505_v22  ;;  %742 = vmatpush1.bf16.msra.mxu1 %v1506_v23  ;;  %v1566_v2 = vld [vmem:[#allocation5 + $0x1e8] ss:$16 sps:$4 sm:$0xff]   ;;  %v276_v3 = vld [vmem:[%s1987_s11] sm:$0xff]  ;;  %v278_v4 = vld [vmem:[%s1987_s11 + $0x10] sm:$0xff]  ;;  %s272_s13 = scalar_lea.vmem [#allocation8], %s1248_s15  ;;  %s1130_s9 = scalar_lea.sflag [#allocation4], %s1983_s27 }
  0x81   : > { %700 = vmatprep.subr.bf16.mxu0 %v1507_v24  ;;  %743 = vmatprep.subr.bf16.mxu1 %v1509_v25  ;;  %v1567_v5 = vld [vmem:[#allocation7 + $0x40] sm:$0xff]   ;;  %v280_v9 = vpack.c.bf16 %v278_v4, %v276_v3  ;;  %v1571_v10 = vld [vmem:[#allocation7 + $0x48] sm:$0xff]   ;;  %v1575_v14 = vld [vmem:[#allocation7 + $0x50] sm:$0xff]   ;;  %s1143_s14 = sshll.u32 %s272_s13, 4  ;;  %p2077_p0 = scmp.ne.s32.totalorder %s2072_s8, 0  ;;  %s2009_s14 = int_to_ptr.vmem [resolvable:$true] %s1143_s14 }
  0x82   : > { %v1568_v6 = vld [vmem:[#allocation7 + $0xc0] sm:$0xff]   ;;  %v1572_v11 = vld [vmem:[#allocation7 + $0xc8] sm:$0xff]   ;;  %v1576_v15 = vld [vmem:[#allocation7 + $0xd0] sm:$0xff]   ;;  %s1693_s6 = scalar_lea.vmem %s2009_s14, 256  ;;  %s1772_s22 = smov [#allocation8]  }
  0x83   : > { %v1569_v7 = vld [vmem:[#allocation7] sm:$0xff]   ;;  %v1573_v12 = vld [vmem:[#allocation7 + $0x8] sm:$0xff]   ;;  %v1577_v16 = vld [vmem:[#allocation7 + $0x10] sm:$0xff]   ;;  %p1694_p11 = scmp.ne.s32.totalorder %s2009_s14, %s1693_s6  ;;  %s1697_s10 = sshll.u32 %s1772_s22, 4  ;;  %s1698_s10 = int_to_ptr.vmem [resolvable:$false] %s1697_s10 }
  0x84   : > { %701 = vmatpush1.bf16.msra.mxu0 %v1511_v26  ;;  %744 = vmatpush1.bf16.msra.mxu1 %v1512_v27  ;;  %v1570_v8 = vld [vmem:[#allocation7 + $0x80] sm:$0xff]   ;;  %v1574_v13 = vld [vmem:[#allocation7 + $0x88] sm:$0xff]   ;;  %v1578_v17 = vld [vmem:[#allocation7 + $0x90] sm:$0xff]   ;;  %s1699_s11 = scalar_lea.vmem %s1698_s10, 512  ;;  %p1700_p5 = scmp.lt.s32.totalorder %s2009_s14, %s1698_s10 }
  0x85   : > { %702 = vmatprep.subr.bf16.mxu0 %v1513_v28  ;;  %745 = vmatprep.subr.bf16.mxu1 %v1515_v29  ;;  %v1579_v18 = vld [vmem:[#allocation7 + $0x58] sm:$0xff]   ;;  %v1583_v22 = vld [vmem:[#allocation7 + $0x60] sm:$0xff]   ;;  %v1587_v26 = vld [vmem:[#allocation7 + $0x68] sm:$0xff]   ;;  %p1695_p2 = pnand %p1694_p11, %p2077_p0  ;;  %p1701_p9 = scmp.lt.s32.totalorder %s1699_s11, %s1693_s6 }
  0x86   : > { %v1580_v19 = vld [vmem:[#allocation7 + $0xd8] sm:$0xff]   ;;  %v1584_v23 = vld [vmem:[#allocation7 + $0xe0] sm:$0xff]   ;;  %v1588_v27 = vld [vmem:[#allocation7 + $0xe8] sm:$0xff]  }
  0x87   : > { %v1581_v20 = vld [vmem:[#allocation7 + $0x18] sm:$0xff]   ;;  %v1585_v24 = vld [vmem:[#allocation7 + $0x20] sm:$0xff]   ;;  %v1589_v28 = vld [vmem:[#allocation7 + $0x28] sm:$0xff]   ;;  %p1696_p3 = pneg %p1695_p2  ;;  %p1702_p12 = por %p1701_p9, %p1700_p5 }
  0x88   : > { %703 = vmatpush1.bf16.msra.mxu0 %v1517_v30  ;;  %746 = vmatpush1.bf16.msra.mxu1 %v1518_v31  ;;  %v1582_v21 = vld [vmem:[#allocation7 + $0x98] sm:$0xff]   ;;  %v1586_v25 = vld [vmem:[#allocation7 + $0xa0] sm:$0xff]   ;;  %v1590_v29 = vld [vmem:[#allocation7 + $0xa8] sm:$0xff]  }
  0x89   : > { %704 = vmatprep.subr.bf16.mxu0 %v1519_v32  ;;  %747 = vmatprep.subr.bf16.mxu1 %v1521_v33  ;;  %v1591_v30 = vld [vmem:[#allocation7 + $0x70] sm:$0xff]   ;;  %p1703_p1 = pnand %p1702_p12, %p1696_p3 }
  0x8a   : > { %v1592_v31 = vld [vmem:[#allocation7 + $0xf0] sm:$0xff]  }
  0x8b   : > { %v1593_v32 = vld [vmem:[#allocation7 + $0x30] sm:$0xff]  }
  0x8c   : > { %705 = vmatpush1.bf16.msra.mxu0 %v1523_v34  ;;  %748 = vmatpush1.bf16.msra.mxu1 %v1524_v35  ;;  %v1594_v33 = vld [vmem:[#allocation7 + $0xb0] sm:$0xff]   ;;  %v1595_v34 = vld [vmem:[#allocation7 + $0x78] sm:$0xff]  }
  0x8d   : > { %706 = vmatprep.subr.bf16.mxu0 %v1525_v36  ;;  %749 = vmatprep.subr.bf16.mxu1 %v1527_v37  ;;  %v1596_v35 = vld [vmem:[#allocation7 + $0xf8] sm:$0xff]  }
  0x8e   : > { %v1597_v36 = vld [vmem:[#allocation7 + $0x38] sm:$0xff]  }
  0x8f   : > { %v1598_v37 = vld [vmem:[#allocation7 + $0xb8] sm:$0xff]  }
  0x90   : > { %707 = vmatpush1.bf16.msra.mxu0 %v1529_v38  ;;  %750 = vmatpush1.bf16.msra.mxu1 %v1530_v39  ;;  %v348_v38 = vlaneseq }
  0x91   : > { %708 = vmatprep.subr.bf16.mxu0 %v1531_v40  ;;  %751 = vmatprep.subr.bf16.mxu1 %v1533_v41 }
  0x92   : > { %v349_v39 = vshrl.u32 %v348_v38, 7 }
  0x94   : > { %709 = vmatpush1.bf16.msra.mxu0 %v1535_v42  ;;  %752 = vmatpush1.bf16.msra.mxu1 %v1536_v43  ;;  %v358_v40 = vsub.s32 2, %v349_v39  ;;  %v362_v41 = vsub.s32 3, %v349_v39  ;;  %v350_v42 = vsub.s32 0, %v349_v39  ;;  %v346_v43 = vld [vmem:[%s2060_s2] sm:$0xf] }
  0x95   : > { %710 = vmatprep.subr.bf16.mxu0 %v1537_v44  ;;  %753 = vmatprep.subr.bf16.mxu1 %v1539_v45  ;;  %v354_v44 = vsub.s32 1, %v349_v39 }
  0x96   : > { %v359_v45 = vrot.slane %v346_v43, %v358_v40  ;;  %v363_v46 = vrot.slane %v346_v43, %v362_v41 }
  0x98   : > { %711 = vmatpush1.bf16.msra.mxu0 %v1541_v47  ;;  %754 = vmatpush1.bf16.msra.mxu1 %v1542_v48  ;;  %v351_v47 = vrot.slane %v346_v43, %v350_v42 }
  0x99   : > { %712 = vmatprep.subr.bf16.mxu0 %v1543_v50  ;;  %755 = vmatprep.subr.bf16.mxu1 %v1545_v52  ;;  %v355_v50 = vrot.slane %v346_v43, %v354_v44 }
  0x9c   : > { %713 = vmatpush1.bf16.msra.mxu0 %v1547_v53  ;;  %756 = vmatpush1.bf16.msra.mxu1 %v1548_v54 }
  0x9d   : > { %714 = vmatprep.subr.bf16.mxu0 %v1549_v55  ;;  %757 = vmatprep.subr.bf16.mxu1 %v1551_v56 }
  0xa0   : > { %715 = vmatpush1.bf16.msra.mxu0 %v1553_v57  ;;  %758 = vmatpush1.bf16.msra.mxu1 %v1554_v58 }
  0xa1   : > { %716 = vmatprep.subr.bf16.mxu0 %v1555_v59  ;;  %759 = vmatprep.subr.bf16.mxu1 %v1557_v60 }
  0xa4   : > { %717 = vmatpush1.bf16.msra.mxu0 %v1559_v61  ;;  %760 = vmatpush1.bf16.msra.mxu1 %v1560_v62 }
  0xa5   : > { %718 = vmatprep.subr.bf16.mxu0 %v1561_v63  ;;  %761 = vmatprep.subr.bf16.mxu1 %v1563_v0 }
  0xa8   : > { %719 = vmatpush1.bf16.msra.mxu0 %v1565_v1  ;;  %762 = vmatpush1.bf16.msra.mxu1 %v1566_v2 }
  0xa9   : > { %1354 = vmatprep.subr.bf16.mxu0 %v1567_v5  ;;  %1376 = vmatprep.subr.bf16.mxu1 %v1568_v6 }
  0xab   : > { %721 = vmatmul.mubr.bf16.vlgmr.msra.gmra.mrb[0].mxu0 %v280_v9  ;;  %764 = vmatmul.mubr.bf16.vlgmr.msra.gmra.mrb[0].mxu1 %v280_v9 }
  0xac   : > { %1355 = vmatpush3.bf16.msra.mxu0 %v1569_v7  ;;  %1377 = vmatpush3.bf16.msra.mxu1 %v1570_v8 }
  0xad   : > { %1356 = vmatprep.subr.bf16.mxu0 %v1571_v10  ;;  %1378 = vmatprep.subr.bf16.mxu1 %v1572_v11  ;;  %v1313_v11 = vld [vmem:[%s2062_s4] ss:$0 sm:$0xff] }
  0xb0   : > { %1357 = vmatpush3.bf16.msra.mxu0 %v1573_v12  ;;  %1379 = vmatpush3.bf16.msra.mxu1 %v1574_v13 }
  0xb1   : > { %1358 = vmatprep.subr.bf16.mxu0 %v1575_v14  ;;  %1380 = vmatprep.subr.bf16.mxu1 %v1576_v15 }
  0xb4   : > { %1359 = vmatpush3.bf16.msra.mxu0 %v1577_v16  ;;  %1381 = vmatpush3.bf16.msra.mxu1 %v1578_v17 }
  0xb5   : > { %1360 = vmatprep.subr.bf16.mxu0 %v1579_v18  ;;  %1382 = vmatprep.subr.bf16.mxu1 %v1580_v19 }
  0xb8   : > { %1361 = vmatpush3.bf16.msra.mxu0 %v1581_v20  ;;  %1383 = vmatpush3.bf16.msra.mxu1 %v1582_v21 }
  0xb9   : > { %1362 = vmatprep.subr.bf16.mxu0 %v1583_v22  ;;  %1384 = vmatprep.subr.bf16.mxu1 %v1584_v23 }
  0xbc   : > { %1363 = vmatpush3.bf16.msra.mxu0 %v1585_v24  ;;  %1385 = vmatpush3.bf16.msra.mxu1 %v1586_v25 }
  0xbd   : > { %1364 = vmatprep.subr.bf16.mxu0 %v1587_v26  ;;  %1386 = vmatprep.subr.bf16.mxu1 %v1588_v27 }
  0xc0   : > { %1365 = vmatpush3.bf16.msra.mxu0 %v1589_v28  ;;  %1387 = vmatpush3.bf16.msra.mxu1 %v1590_v29 }
  0xc1   : > { %1366 = vmatprep.subr.bf16.mxu0 %v1591_v30  ;;  %1388 = vmatprep.subr.bf16.mxu1 %v1592_v31 }
  0xc4   : > { %1367 = vmatpush3.bf16.msra.mxu0 %v1593_v32  ;;  %1389 = vmatpush3.bf16.msra.mxu1 %v1594_v33 }
  0xc5   : > { %1368 = vmatprep.subr.bf16.mxu0 %v1595_v34  ;;  %1390 = vmatprep.subr.bf16.mxu1 %v1596_v35 }
  0xc8   : > { %1369 = vmatpush3.bf16.msra.mxu0 %v1597_v36  ;;  %1391 = vmatpush3.bf16.msra.mxu1 %v1598_v37 }
 0x17e   : > { %v722_v48 = vpop.f32.mrb[0].mxu0  ;;  %v765_v49 = vpop.f32.mrb[0].mxu1 }
 0x17f   : > { %v766_v51 = vadd.f32 %v765_v49, %v359_v45  ;;  %v724_v52 = vpop.f32.mrb[1].mxu0  ;;  %v767_v53 = vpop.f32.mrb[1].mxu1  ;;  %v723_v57 = vadd.f32 %v722_v48, %v351_v47 }
 0x180   : > { %v768_v54 = vadd.f32 %v767_v53, %v363_v46  ;;  %v726_v55 = vpop.f32.mrb[2].mxu0  ;;  %v769_v56 = vpop.f32.mrb[2].mxu1  ;;  %v725_v62 = vadd.f32 %v724_v52, %v355_v50 }
 0x181   : > { %v727_v58 = vadd.f32 %v726_v55, %v351_v47  ;;  %v770_v59 = vadd.f32 %v769_v56, %v359_v45  ;;  %v728_v60 = vpop.f32.mrb[3].mxu0  ;;  %v771_v61 = vpop.f32.mrb[3].mxu1 }
 0x182   : > { %v729_v63 = vadd.f32 %v728_v60, %v355_v50  ;;  %v772_v0 = vadd.f32 %v771_v61, %v363_v46 }
 0x183   : > { %v774_v1 = vpack.c.bf16 %v727_v58, %v723_v57  ;;  %v776_v2 = vpack.c.bf16 %v770_v59, %v766_v51 }
 0x184   : > { %v775_v3 = vpack.c.bf16 %v729_v63, %v725_v62  ;;  %v777_v4 = vpack.c.bf16 %v772_v0, %v768_v54 }
 0x185   : > { %1599 = vtanh.bf16 %v774_v1 }
 0x186   : > { %1601 = vtanh.bf16 %v775_v3 }
 0x187   : > { %1603 = vtanh.bf16 %v777_v4 }
 0x188   : > { %1605 = vtanh.bf16 %v776_v2 }
 0x190   : > { %v1600_v5 = vpop.eup %1599 }
 0x191   : > { %v1602_v6 = vpop.eup %1601 }
 0x192   : > { %v1604_v7 = vpop.eup %1603  ;;  %1077 = vmatprep.mubr.bf16.mxu0 %v1602_v6 }
 0x193   : > { %v1606_v8 = vpop.eup %1605  ;;  %1118 = vmatprep.mubr.bf16.mxu1 %v1604_v7  ;;  %1078 = vmatmul.mubr.bf16.vlgmr.msra.gmra.mrb[4].mxu0 %v1600_v5 }
 0x194   : > { %1119 = vmatmul.mubr.bf16.vlgmr.msra.gmra.mrb[4].mxu1 %v1606_v8 }
 0x266   : > { %v1370_v9 = vpop.f32.mrb[4].mxu0 }
 0x267   : > { %v1392_v10 = vpop.f32.mrb[4].mxu1  ;;  %v1371_v12 = vpop.f32.mrb[5].mxu0 }
 0x268   : > { %v1372_v13 = vadd.f32 %v1371_v12, %v1370_v9  ;;  %v1393_v14 = vpop.f32.mrb[5].mxu1  ;;  %v1373_v15 = vpop.f32.mrb[6].mxu0 }
 0x269   : > { %v1394_v16 = vadd.f32 %v1393_v14, %v1392_v10  ;;  %v1395_v17 = vpop.f32.mrb[6].mxu1  ;;  %v1374_v18 = vpop.f32.mrb[7].mxu0 }
 0x26a   : > { %v1080_v19 = vadd.f32 %v1372_v13, %v1313_v11  ;;  %v1375_v20 = vadd.f32 %v1374_v18, %v1373_v15  ;;  %v1396_v21 = vpop.f32.mrb[7].mxu1 }
 0x26b   : > { %v1397_v22 = vadd.f32 %v1396_v21, %v1395_v17 }
 0x26c   : > { %v1121_v23 = vadd.f32 %v1394_v16, %v1080_v19  ;;  %v1083_v24 = vadd.f32 %v1375_v20, %v1313_v11 }
 0x26e   : > { %1127 = vst [vmem:[%s272_s13] sm:$0xff] %v1121_v23  ;;  %v1124_v25 = vadd.f32 %v1397_v22, %v1083_v24 }
 0x270   : > { %1128 = vst [vmem:[%s272_s13 + $0x8] sm:$0xff] %v1124_v25 }
 0x271   : > { %1706 = shalt.err (!%p1703_p1)
}
 0x272   : > { %s1707_s24 = scalar_lea.hbm %s2014_s30, 256  ;;  %s1711_s16 = scalar_lea.hbm %s2063_s5, 512 }
 0x273   : > { %p1708_p13 = scmp.ne.s32.totalorder %s2014_s30, %s1707_s24  ;;  %p1712_p4 = scmp.lt.u32.totalorder %s2014_s30, %s2063_s5 }
 0x274   : > { %p1713_p7 = scmp.lt.u32.totalorder %s1711_s16, %s1707_s24  ;;  %p1715_p11 = scmp.lt.u32.totalorder %s1707_s24, %s2014_s30 }
 0x275   : > { %p1709_p6 = pnand %p1708_p13, %p2077_p0 }
 0x276   : > { %p1714_p8 = por %p1713_p7, %p1712_p4 }
 0x277   : > { %p1710_p10 = pneg %p1709_p6 }
 0x278   : > { %p1716_p2 = por %p1715_p11, %p1714_p8 }
 0x27a   : > { %p1717_p3 = pnand %p1716_p2, %p1710_p10 }
 0x27c   : > { %1720 = shalt.err (!%p1717_p3)
}
 0x27d   : > { %s1773_s17 = smov 128   ;;  %s1774_s29 = smov 8  }
 0x27e   : > { %1408 = dma.vmem_to_hbm [thread:$0]  (%p2077_p0), %s2009_s14, 256, %s2014_s30, %s1130_s9, %s1773_s17, %s1773_s17, %s1774_s29  }
 0x27f PF: > { %s1158_s12 = sand.u32 1, %s1751_s18   ;;  %p2078_p5 = scmp.ne.s32.totalorder %s2068_s25, 0 }
 0x280   : > { %p2079_p9 = scmp.ge.s32.totalorder %s1763_s21, 2  ;;  %s1159_s6 = scalar_lea.sflag [#allocation4], %s1158_s12 }
 0x282   : > { %p1422_p12 = pnand %p2079_p9, %p2078_p5 }
 0x284   : > { %1746 = dma.done.wait (!%p1422_p12), %s1159_s6, 256  }
 0x285   : > { %1748 = vsyncadd (!%p1422_p12), %s1159_s6, 4294967040  ;;  %p19_p1 = scmp.ge.s32.totalorder %s1918_s23, 4   ;;  %s2080_s18 = smov %s1755_s19 }
 0x286   : > { %s2081_s19 = smov %s1759_s20  ;;  %s2082_s20 = smov %s1927_s7 }
 0x287   : > { %s2083_s21 = smov %s1918_s23  ;;  %21 = sbr.rel (!%p19_p1) target bundleno = 6 (0x6), region = 93 }
 0x28e   :  { %1164 = vsyncpa [#allocation3], 1 }
 0x28f   :  { %1166 = vsyncpa [#allocation3 + $0x1], 1 }
 0x290   :  { %1167 = vsyncpa [#allocation6], 1 }
 0x291   :  { %1168 = vsyncpa [#allocation4], 1 }
 0x292   :  { %1170 = vsyncpa [#allocation4 + $0x1], 1 }

</bundles_post_ra>
